<compile_context>
chip_gen: v7x
topology: tpu7x:2x2x1
jax: 0.10.0
libtpu: 0.0.40
codegen_flags: <defaults>
</compile_context>

<pallas_src>
import functools

import jax
import jax.numpy as jnp
from jax.experimental import pallas as pl
from jax.experimental.pallas import tpu as pltpu


def _round_up(v, m):
    return (v + m - 1) // m * m


def _choose_tiles(n, bc, tile_n_cap=64, tile_i_cap=256, slab_budget=8 << 20):
    """Pick (tile_n, tile_i).

    tile_i is kept a multiple of tile_n so padding N to a multiple of tile_i
    is valid for both views of M.  The f32 diff slab (tile_n*tile_i*bc*4 B) is
    kept within `slab_budget` so the kernel fits v7x's 64 MiB VMEM.
    """
    # Cap tile_n so even a square (tile_n x tile_n) pair block fits the budget
    # (matters only for very large out_features*kernel_dims).
    tn_budget = max(8, int((slab_budget // (4 * bc)) ** 0.5) // 8 * 8)
    tile_n = max(8, min(tile_n_cap, _round_up(n, 8), tn_budget) // 8 * 8)
    rows_budget = max(tile_n,
                      (slab_budget // (4 * bc * tile_n)) // tile_n * tile_n)
    tile_i = min(tile_i_cap, _round_up(n, tile_n), rows_budget)
    tile_i = max(tile_n, tile_i // tile_n * tile_n)
    return tile_n, tile_i


def _mbd_kernel(xj_ref, mj_ref, mi_ref, negs_ref, out_ref, acc_ref, *,
                scale, pad, n_valid, mask_tail, mxu_dtype):
    """One (j, i) grid step of minibatch discrimination.

    xj_ref  : (tile_n, F)   query rows of x (pass-through columns)
    mj_ref  : (tile_n, BC)  precomputed projection M, query rows
    mi_ref  : (tile_i, BC)  precomputed projection M, "other" rows
    negs_ref: (BC, B)       block summation matrix, entries -1 (exp sign folded)
    out_ref : (tile_n, W)   lane-dense fused output [x | o_b | 0-pad]
    acc_ref : (tile_n, B)   scratch, running sum_i exp(-||m_j - m_i||_1)
    """
    i_blk = pl.program_id(1)
    num_i = pl.num_programs(1)

    tile_n, _ = xj_ref.shape
    tile_i, bc = mi_ref.shape
    b = negs_ref.shape[1]

    # ---- init on the first i-step of every j-tile ------------------------
    @pl.when(i_blk == 0)
    def _():
        acc_ref[...] = jnp.zeros_like(acc_ref)

    mat_j = mj_ref[...]                                            # (tn, BC)
    mat_i = mi_ref[...]                                            # (ti, BC)

    # All pairwise abs-diffs, flattened so the lane dim stays BC (no relayout).
    diff = jnp.abs(mat_j[:, None, :] - mat_i[None, :, :])          # (tn, ti, BC)
    diff2 = diff.reshape(tile_n * tile_i, bc).astype(mxu_dtype)    # MXU operand

    # One MXU matmul -> negated per-block L1 norm (sign folded into negs).
    neg_norm = jnp.dot(diff2, negs_ref[...],
                       preferred_element_type=jnp.float32)         # (tn*ti, B)

    # TODO(synk): for out_features < 128 in production, restructure to a
    # lane-dense exp (i rows on the lane axis) to cut EUP work by 128/B; on
    # v6e/v7x the exp itself can also run in bf16 after accuracy validation.
    e = jnp.exp(neg_norm).reshape(tile_n, tile_i, b)                # EUP, f32

    if mask_tail:
        # Zero the contribution of padded "other" rows (global idx >= n_valid).
        idx = jax.lax.broadcasted_iota(jnp.int32, (tile_n, tile_i, b), 1)
        e = jnp.where(idx + i_blk * tile_i < n_valid, e, 0.0)

    # Per-query-row sum over i: sublane reduce on the XLU (seg matmul removed).
    acc_ref[...] += e.sum(axis=1)                                   # (tn, B)

    # ---- epilogue on the last i-step: self-term, scale, fused store ------
    @pl.when(i_blk == num_i - 1)
    def _():
        o_b = acc_ref[...] - 1.0                 # remove exp(0) self term
        if scale != 1.0:
            o_b = o_b * scale                    # folded mean scaling
        pieces = [xj_ref[...].astype(jnp.float32), o_b]
        if pad:
            pieces.append(jnp.zeros((tile_n, pad), jnp.float32))
        out_ref[...] = jnp.concatenate(pieces, axis=1).astype(out_ref.dtype)


def minibatch_discrimination(x, T, *, mean=False, mxu_dtype=jnp.bfloat16,
                             tile_n_cap=64, tile_i_cap=256):
    """x: (N, in_features); T: (in_features, out_features, kernel_dims).

    Returns concat([x, o_b], axis=1) with o_b: (N, out_features), matching the
    PyTorch module's forward semantics.
    """
    n, in_features = x.shape
    in_f, out_features, kernel_dims = T.shape
    assert in_f == in_features
    bc = out_features * kernel_dims

    x = x.astype(jnp.float32)
    t_flat = T.reshape(in_features, bc).astype(jnp.float32)

    # Projection hoisted out of the pairwise grid: one O(N*F*BC) GEMM.  Both
    # kernel views (query / other) read this SAME array so the self-diff is
    # exactly zero and `acc - 1` is exact.
    m = jnp.dot(x, t_flat, preferred_element_type=jnp.float32)      # (N, BC)

    # Block summation matrix with exp(-.) sign folded in:
    #   negs[b*C + c, b] = -1  (matches T.view's row-major flattening).
    negs = (-jnp.repeat(jnp.eye(out_features, dtype=jnp.float32),
                        kernel_dims, axis=0)).astype(mxu_dtype)     # (BC, B)

    tile_n, tile_i = _choose_tiles(n, bc, tile_n_cap, tile_i_cap)
    n_pad = _round_up(max(n, tile_i), tile_i)     # tile_i is a multiple of tile_n
    mask_tail = n_pad != n
    if mask_tail:
        x_p = jnp.pad(x, ((0, n_pad - n), (0, 0)))
        m_p = jnp.pad(m, ((0, n_pad - n), (0, 0)))
    else:
        x_p, m_p = x, m

    num_j = n_pad // tile_n
    num_i = n_pad // tile_i

    out_w = _round_up(in_features + out_features, 128)   # lane-dense output
    pad = out_w - in_features - out_features
    scale = 1.0 / (n - 1) if mean else 1.0

    # VMEM: f32 diff slab (+ bf16 copy, exp tile, double-buffered inputs).
    slab_bytes = tile_n * tile_i * bc * 4
    vmem_limit = int(min(96 << 20, max(32 << 20, 4 * slab_bytes)))

    kernel = functools.partial(_mbd_kernel, scale=scale, pad=pad,
                               n_valid=n, mask_tail=mask_tail,
                               mxu_dtype=mxu_dtype)

    out = pl.pallas_call(
        kernel,
        out_shape=jax.ShapeDtypeStruct((n_pad, out_w), jnp.float32),
        grid_spec=pltpu.PrefetchScalarGridSpec(
            num_scalar_prefetch=0,
            grid=(num_j, num_i),
            in_specs=[
                pl.BlockSpec((tile_n, in_features), lambda j, i: (j, 0)),   # x query rows
                pl.BlockSpec((tile_n, bc), lambda j, i: (j, 0)),            # M query rows
                pl.BlockSpec((tile_i, bc), lambda j, i: (i, 0)),            # M other rows
                pl.BlockSpec((bc, out_features), lambda j, i: (0, 0)),      # -sum matrix
            ],
            out_specs=pl.BlockSpec((tile_n, out_w), lambda j, i: (j, 0)),
            scratch_shapes=[
                pltpu.VMEM((tile_n, out_features), jnp.float32),            # accumulator
            ],
        ),
        compiler_params=pltpu.CompilerParams(
            dimension_semantics=("parallel", "arbitrary"),
            vmem_limit_bytes=vmem_limit,
        ),
    )(x_p, m_p, m_p, negs)

    return out[:n, :in_features + out_features]


def _reference(x, T, mean=False):
    """Pure-JAX reference mirroring the PyTorch forward."""
    n, in_features = x.shape
    _, out_features, kernel_dims = T.shape
    matrices = x @ T.reshape(in_features, -1)
    matrices = matrices.reshape(n, out_features, kernel_dims)
    M = matrices[None, :, :, :]          # (1, N, B, C)
    M_T = matrices[:, None, :, :]        # (N, 1, B, C)
    norm = jnp.abs(M - M_T).sum(3)       # (N, N, B)
    expnorm = jnp.exp(-norm)
    o_b = expnorm.sum(0) - 1.0           # (N, B)
    if mean:
        o_b = o_b / (n - 1)
    return jnp.concatenate([x, o_b], axis=1)


if __name__ == "__main__":
    N = 8
    IN_FEATURES = 32
    OUT_FEATURES = 16
    KERNEL_DIMS = 8

    key = jax.random.PRNGKey(0)
    kx, kt = jax.random.split(key)
    x = jax.random.normal(kx, (N, IN_FEATURES), dtype=jnp.float32)
    T = jax.random.normal(kt, (IN_FEATURES, OUT_FEATURES, KERNEL_DIMS),
                          dtype=jnp.float32)

    # Default path (bf16 MXU operands for the L1-norm reduction matmul).
    out = jax.block_until_ready(minibatch_discrimination(x, T, mean=False))
    ref = _reference(x, T, mean=False)
    assert out.shape == (N, IN_FEATURES + OUT_FEATURES)
    assert jnp.allclose(out, ref, atol=2e-3, rtol=2e-3), "mismatch (bf16 path)"

    # mean=True path (scaling folded into the kernel epilogue).
    out_m = jax.block_until_ready(minibatch_discrimination(x, T, mean=True))
    ref_m = _reference(x, T, mean=True)
    assert jnp.allclose(out_m, ref_m, atol=2e-3, rtol=2e-3), "mismatch (mean)"

    # Non-tile-divisible N exercises padding + masking of the padded "other"
    # rows; the f32 MXU path is checked tightly against the reference.
    N2 = 12
    x2 = jax.random.normal(jax.random.PRNGKey(1), (N2, IN_FEATURES),
                           dtype=jnp.float32)
    out2 = jax.block_until_ready(
        minibatch_discrimination(x2, T, mean=False, mxu_dtype=jnp.float32))
    ref2 = _reference(x2, T, mean=False)
    assert out2.shape == (N2, IN_FEATURES + OUT_FEATURES)
    assert jnp.allclose(out2, ref2, atol=1e-4, rtol=1e-4), "mismatch (masked)"

    print("KERNEL_OK")
</pallas_src>

<mosaic_0001>
module attributes {stable_mosaic.version = 11 : i64} {
  func.func @_mbd_kernel(%arg0: i32, %arg1: i32, %arg2: memref<8x32xf32, #tpu.memory_space<vmem>>, %arg3: memref<8x128xf32, #tpu.memory_space<vmem>>, %arg4: memref<8x128xf32, #tpu.memory_space<vmem>>, %arg5: memref<128x16xbf16, #tpu.memory_space<vmem>>, %arg6: memref<8x128xf32, #tpu.memory_space<vmem>>, %arg7: memref<8x16xf32, #tpu.memory_space<vmem>>) attributes {dimension_semantics = [#tpu.dimension_semantics<parallel>, #tpu.dimension_semantics<arbitrary>], iteration_bounds = array<i64: 1, 1>, scalar_prefetch = 0 : i64, scratch_operands = 1 : i64, tpu.core_type = #tpu.core_type<tc>, window_params = [{transform_indices = @transform_0, window_bounds = array<i64: 8, 32>}, {transform_indices = @transform_1, window_bounds = array<i64: 8, 128>}, {transform_indices = @transform_2, window_bounds = array<i64: 8, 128>}, {pipeline_mode = #tpu.pipeline_mode<synchronous>, transform_indices = @transform_3, window_bounds = array<i64: 128, 16>}, {transform_indices = @transform_4, window_bounds = array<i64: 8, 128>}]} {
    %c0_i32 = arith.constant 0 : i32
    %0 = arith.cmpi eq, %arg1, %c0_i32 : i32
    %1 = arith.extui %0 : i1 to i32
    %c0_i32_0 = arith.constant 0 : i32
    %2 = arith.cmpi ne, %1, %c0_i32_0 : i32
    scf.if %2 {
      %cst_13 = arith.constant 0.000000e+00 : f32
      %24 = vector.broadcast %cst_13 : f32 to vector<8x16xf32>
      %c0_14 = arith.constant 0 : index
      %c0_15 = arith.constant 0 : index
      %25 = vector.load %arg7[%c0_14, %c0_15] : memref<8x16xf32, #tpu.memory_space<vmem>>, vector<8x16xf32>
      tpu.vector_store %arg7[%c0_14, %c0_15], %24 {strides = array<i32>} : memref<8x16xf32, #tpu.memory_space<vmem>>, vector<8x16xf32>,
    } else {
    }
    %c0 = arith.constant 0 : index
    %c0_1 = arith.constant 0 : index
    %3 = vector.load %arg3[%c0, %c0_1] : memref<8x128xf32, #tpu.memory_space<vmem>>, vector<8x128xf32>
    %c0_2 = arith.constant 0 : index
    %c0_3 = arith.constant 0 : index
    %4 = vector.load %arg4[%c0_2, %c0_3] : memref<8x128xf32, #tpu.memory_space<vmem>>, vector<8x128xf32>
    %5 = vector.shape_cast %3 : vector<8x128xf32> to vector<8x1x128xf32>
    %6 = vector.shape_cast %4 : vector<8x128xf32> to vector<1x8x128xf32>
    %7 = vector.broadcast %5 : vector<8x1x128xf32> to vector<8x8x128xf32>
    %8 = vector.broadcast %6 : vector<1x8x128xf32> to vector<8x8x128xf32>
    %9 = arith.subf %7, %8 : vector<8x8x128xf32>
    %10 = math.absf %9 : vector<8x8x128xf32>
    %11 = vector.shape_cast %10 : vector<8x8x128xf32> to vector<64x128xf32>
    %12 = arith.truncf %11 : vector<64x128xf32> to vector<64x128xbf16>
    %c0_4 = arith.constant 0 : index
    %c0_5 = arith.constant 0 : index
    %13 = vector.load %arg5[%c0_4, %c0_5] : memref<128x16xbf16, #tpu.memory_space<vmem>>, vector<128x16xbf16>
    %cst = arith.constant dense<0.000000e+00> : vector<64x16xf32>
    %14 = tpu.matmul %12, %13, %cst {dimension_numbers = #tpu.dot_dimension_numbers<[1], [0], [0], [1], [0, 0, 1, 1], [], []>} : vector<64x128xbf16>, vector<128x16xbf16>, vector<64x16xf32> -> vector<64x16xf32>
    %15 = math.exp %14 : vector<64x16xf32>
    %16 = vector.shape_cast %15 : vector<64x16xf32> to vector<8x8x16xf32>
    %c0_6 = arith.constant 0 : index
    %c0_7 = arith.constant 0 : index
    %17 = vector.load %arg7[%c0_6, %c0_7] : memref<8x16xf32, #tpu.memory_space<vmem>>, vector<8x16xf32>
    %cst_8 = arith.constant dense<0.000000e+00> : vector<8x16xf32>
    %18 = vector.multi_reduction <add>, %16, %cst_8 [1] : vector<8x8x16xf32> to vector<8x16xf32>
    %19 = arith.addf %17, %18 : vector<8x16xf32>
    %c0_9 = arith.constant 0 : index
    %c0_10 = arith.constant 0 : index
    %20 = vector.load %arg7[%c0_9, %c0_10] : memref<8x16xf32, #tpu.memory_space<vmem>>, vector<8x16xf32>
    tpu.vector_store %arg7[%c0_9, %c0_10], %19 {strides = array<i32>} : memref<8x16xf32, #tpu.memory_space<vmem>>, vector<8x16xf32>,
    %c0_i32_11 = arith.constant 0 : i32
    %21 = arith.cmpi eq, %arg1, %c0_i32_11 : i32
    %22 = arith.extui %21 : i1 to i32
    %c0_i32_12 = arith.constant 0 : i32
    %23 = arith.cmpi ne, %22, %c0_i32_12 : i32
    scf.if %23 {
      %c0_13 = arith.constant 0 : index
      %c0_14 = arith.constant 0 : index
      %24 = vector.load %arg7[%c0_13, %c0_14] : memref<8x16xf32, #tpu.memory_space<vmem>>, vector<8x16xf32>
      %cst_15 = arith.constant 1.000000e+00 : f32
      %25 = vector.broadcast %cst_15 : f32 to vector<8x16xf32>
      %26 = arith.subf %24, %25 : vector<8x16xf32>
      %c0_16 = arith.constant 0 : index
      %c0_17 = arith.constant 0 : index
      %27 = vector.load %arg2[%c0_16, %c0_17] : memref<8x32xf32, #tpu.memory_space<vmem>>, vector<8x32xf32>
      %cst_18 = arith.constant 0.000000e+00 : f32
      %28 = vector.broadcast %cst_18 : f32 to vector<8x80xf32>
      %29 = tpu.concatenate %27, %26, %28 in 1 : vector<8x32xf32>, vector<8x16xf32>, vector<8x80xf32> -> vector<8x128xf32>
      %c0_19 = arith.constant 0 : index
      %c0_20 = arith.constant 0 : index
      %30 = vector.load %arg6[%c0_19, %c0_20] : memref<8x128xf32, #tpu.memory_space<vmem>>, vector<8x128xf32>
      tpu.vector_store %arg6[%c0_19, %c0_20], %29 {strides = array<i32>} : memref<8x128xf32, #tpu.memory_space<vmem>>, vector<8x128xf32>,
    } else {
    }
    return
  }
  func.func @transform_0(%arg0: i32, %arg1: i32) -> (i32, i32) {
    %c0_i32 = arith.constant 0 : i32
    %c0_i32_0 = arith.constant 0 : i32
    return %arg0, %c0_i32 : i32, i32
  }
  func.func @transform_1(%arg0: i32, %arg1: i32) -> (i32, i32) {
    %c0_i32 = arith.constant 0 : i32
    %c0_i32_0 = arith.constant 0 : i32
    return %arg0, %c0_i32 : i32, i32
  }
  func.func @transform_2(%arg0: i32, %arg1: i32) -> (i32, i32) {
    %c0_i32 = arith.constant 0 : i32
    %c0_i32_0 = arith.constant 0 : i32
    return %arg1, %c0_i32 : i32, i32
  }
  func.func @transform_3(%arg0: i32, %arg1: i32) -> (i32, i32) {
    %c0_i32 = arith.constant 0 : i32
    %c0_i32_0 = arith.constant 0 : i32
    %c0_i32_1 = arith.constant 0 : i32
    return %c0_i32, %c0_i32_0 : i32, i32
  }
  func.func @transform_4(%arg0: i32, %arg1: i32) -> (i32, i32) {
    %c0_i32 = arith.constant 0 : i32
    %c0_i32_0 = arith.constant 0 : i32
    return %arg0, %c0_i32 : i32, i32
  }
}

</mosaic_0001>

<bundles_post_ra>
// kernel: tpu_custom_call.1
= control target key start
LH: loop header
LB: loop body
LE: loop exit
PB: predicated region body
PF: predicated region fallthrough
CT: control target
= control target key end

     0   :  { %v32_v3 = vlaneseq  ;;  %s592_s0 = inlined_call_operand.vmem [shape: f32[8,32], index: 0, kind: input, shape index: {}]   ;;  %s593_s1 = inlined_call_operand.vmem [shape: f32[8,128], index: 1, kind: input, shape index: {}]   ;;  %s594_s2 = inlined_call_operand.vmem [shape: f32[8,128], index: 2, kind: input, shape index: {}]   ;;  %s595_s3 = inlined_call_operand.vmem [shape: bf16[128,16], index: 3, kind: input, shape index: {}]   ;;  %s596_s4 = inlined_call_operand.hbm [shape: f32[8,128], index: 4, kind: output, shape index: {}]  }
   0x1   :  { %v459_v0 = vld [vmem:[%s595_s3] sm:$0xff]   ;;  %v460_v1 = vld [vmem:[%s595_s3 + $0x8] sm:$0xff]   ;;  %v461_v2 = vld [vmem:[%s595_s3 + $0x10] sm:$0xff]  }
   0x2   :  { %415 = vmatprep.subr.bf16.mxu0 %v459_v0  ;;  %439 = vmatprep.subr.bf16.mxu1 %v459_v0  ;;  %v462_v4 = vld [vmem:[%s595_s3 + $0x18] sm:$0xff]   ;;  %v25_v5 = vld [vmem:[%s593_s1] sm:$0xff] }
   0x3   :  { %416 = vmatpush3.bf16.msra.mxu0 %v459_v0  ;;  %447 = vmatpush3.bf16.msra.mxu1 %v459_v0 }
   0x4   :  { %417 = vmatprep.subr.bf16.mxu0 %v460_v1  ;;  %440 = vmatprep.subr.bf16.mxu1 %v460_v1 }
   0x7   :  { %418 = vmatpush3.bf16.msra.mxu0 %v460_v1  ;;  %448 = vmatpush3.bf16.msra.mxu1 %v460_v1 }
   0x8   :  { %419 = vmatprep.subr.bf16.mxu0 %v461_v2  ;;  %441 = vmatprep.subr.bf16.mxu1 %v461_v2 }
   0x9   :  { %9 = vsyncpa [#allocation4], 0  ;;  %v508_v6 = vmov 1966171168   ;;  %v33_v8 = vshrl.u32 %v32_v3, 7  ;;  %v28_v10 = vcombine.high %v25_v5, %v25_v5  ;;  %v463_v11 = vld [vmem:[%s595_s3 + $0x20] sm:$0xff]  }
   0xa   :  { %v30_v7 = vunpack.c.l.s4 %v508_v6  ;;  %v464_v16 = vld [vmem:[%s595_s3 + $0x28] sm:$0xff]   ;;  %v26_v21 = vld [vmem:[%s594_s2] sm:$0xff]  ;;  %v465_v25 = vld [vmem:[%s595_s3 + $0x30] sm:$0xff]   ;;  %vm23_vm0 = vcmask 130048   ;;  %v509_v58 = vmov 0.0   ;;  %vm348_vm1 = vcmask 1041409  }
   0xb   :  { %420 = vmatpush3.bf16.msra.mxu0 %v461_v2  ;;  %449 = vmatpush3.bf16.msra.mxu1 %v461_v2  ;;  %v79_v14 = vsub.s32 0, %v33_v8  ;;  %v466_v41 = vld [vmem:[%s595_s3 + $0x38] sm:$0xff]   ;;  %24 = vst.msk [vmem:[#allocation2] sm:$0xff] %vm23_vm0, %v509_v58  ;;  %vm350_vm2 = vcmask 1042434   ;;  %vm352_vm3 = vcmask 1043459   ;;  %vm354_vm4 = vcmask 1044484  }
   0xc   :  { %v31_v9 = vunpack.c.0.s8 %v30_v7  ;;  %421 = vmatprep.subr.bf16.mxu0 %v462_v4  ;;  %442 = vmatprep.subr.bf16.mxu1 %v462_v4  ;;  %vm356_vm5 = vcmask 1045509   ;;  %vm358_vm6 = vcmask 1046534   ;;  %vm360_vm7 = vcmask 1047559   ;;  %s510_s3 = smov 32   ;;  %s511_s9 = smov [#allocation3]  }
   0xd   :  { %vm375_vm8 = vcmask 261120   ;;  %s386_s10 = sshll.u32 %s511_s9, 4  ;;  %vm377_vm9 = vcmask 392192   ;;  %s387_s10 = int_to_ptr.vmem [resolvable:$true] %s386_s10 }
   0xe   :  { %v34_v12 = vsub.s32 %v31_v9, %v33_v8  ;;  %s484_s11 = scalar_lea.vmem %s387_s10, 128  ;;  %p489_p1 = scmp.lt.s32.totalorder %s387_s10, %s387_s10 }
   0xf   :  { %422 = vmatpush3.bf16.msra.mxu0 %v462_v4  ;;  %450 = vmatpush3.bf16.msra.mxu1 %v462_v4  ;;  %p485_p0 = scmp.ne.s32.totalorder %s387_s10, %s484_s11  ;;  %p490_p2 = scmp.lt.s32.totalorder %s484_s11, %s484_s11 }
  0x10   :  { %v35_v13 = vrot.slane %v25_v5, %v34_v12  ;;  %v42_v15 = vrot.slane %v28_v10, %v34_v12  ;;  %423 = vmatprep.subr.bf16.mxu0 %v463_v11  ;;  %443 = vmatprep.subr.bf16.mxu1 %v463_v11 }
  0x11   :  { %p491_p3 = por %p490_p2, %p489_p1 }
  0x12   :  { %v43_v17 = vcombine.high %v35_v13, %v35_v13  ;;  %v51_v18 = vrot.slane %v35_v13, %v34_v12  ;;  %v44_v19 = vcombine.high %v42_v15, %v42_v15  ;;  %v58_v20 = vrot.slane %v42_v15, %v34_v12 }
  0x13   :  { %424 = vmatpush3.bf16.msra.mxu0 %v463_v11  ;;  %451 = vmatpush3.bf16.msra.mxu1 %v463_v11  ;;  %p492_p4 = pnand %p491_p3, %p485_p0 }
  0x14   :  { %v65_v22 = vrot.slane %v43_v17, %v34_v12  ;;  %v73_v23 = vcombine.high %v51_v18, %v51_v18  ;;  %v80_v24 = vrot.slane %v51_v18, %v79_v14  ;;  %425 = vmatprep.subr.bf16.mxu0 %v464_v16  ;;  %444 = vmatprep.subr.bf16.mxu1 %v464_v16 }
  0x15   :  { %v72_v26 = vrot.slane %v44_v19, %v34_v12  ;;  %v74_v27 = vcombine.high %v58_v20, %v58_v20  ;;  %v96_v28 = vrot.slane %v58_v20, %v79_v14 }
  0x16   :  { %v75_v29 = vcombine.high %v65_v22, %v65_v22  ;;  %v84_v30 = vrot.slane %v65_v22, %v79_v14  ;;  %v117_v31 = vsub.f32 %v80_v24, %v26_v21  ;;  %v88_v32 = vrot.slane %v73_v23, %v79_v14 }
  0x17   :  { %v76_v33 = vcombine.high %v72_v26, %v72_v26  ;;  %v100_v34 = vrot.slane %v72_v26, %v79_v14  ;;  %v121_v35 = vsub.f32 %v96_v28, %v26_v21  ;;  %v104_v36 = vrot.slane %v74_v27, %v79_v14  ;;  %426 = vmatpush3.bf16.msra.mxu0 %v464_v16 }
  0x18   :  { %452 = vmatpush3.bf16.msra.mxu1 %v464_v16  ;;  %v118_v37 = vsub.f32 %v84_v30, %v26_v21  ;;  %v125_v38 = vand.u32 2147483647, %v117_v31  ;;  %v92_v39 = vrot.slane %v75_v29, %v79_v14  ;;  %v119_v40 = vsub.f32 %v88_v32, %v26_v21  ;;  %427 = vmatprep.subr.bf16.mxu0 %v465_v25 }
  0x19   :  { %445 = vmatprep.subr.bf16.mxu1 %v465_v25  ;;  %v122_v42 = vsub.f32 %v100_v34, %v26_v21  ;;  %v129_v43 = vand.u32 2147483647, %v121_v35  ;;  %v108_v44 = vrot.slane %v76_v33, %v79_v14  ;;  %v123_v45 = vsub.f32 %v104_v36, %v26_v21 }
  0x1a   :  { %v126_v46 = vand.u32 2147483647, %v118_v37  ;;  %v120_v47 = vsub.f32 %v92_v39, %v26_v21  ;;  %v127_v49 = vand.u32 2147483647, %v119_v40 }
  0x1b   :  { %v130_v48 = vand.u32 2147483647, %v122_v42  ;;  %v124_v50 = vsub.f32 %v108_v44, %v26_v21  ;;  %v131_v51 = vand.u32 2147483647, %v123_v45  ;;  %428 = vmatpush3.bf16.msra.mxu0 %v465_v25 }
  0x1c   :  { %453 = vmatpush3.bf16.msra.mxu1 %v465_v25  ;;  %v133_v52 = vpack.c.bf16 %v126_v46, %v125_v38  ;;  %v128_v53 = vand.u32 2147483647, %v120_v47  ;;  %429 = vmatprep.subr.bf16.mxu0 %v466_v41 }
  0x1d   :  { %446 = vmatprep.subr.bf16.mxu1 %v466_v41  ;;  %v135_v54 = vpack.c.bf16 %v130_v48, %v129_v43  ;;  %v132_v55 = vand.u32 2147483647, %v124_v50 }
  0x1e   :  { %431 = vmatprep.mubr.bf16.mxu0 %v133_v52  ;;  %v134_v56 = vpack.c.bf16 %v128_v53, %v127_v49 }
  0x1f   :  { %435 = vmatprep.mubr.bf16.mxu1 %v135_v54  ;;  %v136_v57 = vpack.c.bf16 %v132_v55, %v131_v51  ;;  %430 = vmatpush3.bf16.msra.mxu0 %v466_v41 }
  0x20   :  { %454 = vmatpush3.bf16.msra.mxu1 %v466_v41 }
  0x22   :  { %432 = vmatmul.mubr.bf16.vlgmr.msra.gmra.mrb[0].mxu0 %v134_v56 }
  0x23   :  { %436 = vmatmul.mubr.bf16.vlgmr.msra.gmra.mrb[0].mxu1 %v136_v57 }
  0xf5   :  { %v433_v59 = vpop.f32.mrb[0].mxu0 }
  0xf6   :  { %v437_v60 = vpop.f32.mrb[0].mxu1  ;;  %v270_v61 = vmul.f32 1.442695, %v433_v59  ;;  %v235_v63 = vpop.f32.mrb[1].mxu0 }
  0xf7   :  { %v278_v62 = vmul.f32 1.442695, %v437_v60  ;;  %v251_v0 = vpop.f32.mrb[1].mxu1  ;;  %v266_v1 = vmul.f32 1.442695, %v235_v63  ;;  %v434_v3 = vpop.f32.mrb[2].mxu0 }
  0xf8   :  { %v274_v2 = vmul.f32 1.442695, %v251_v0  ;;  %v438_v4 = vpop.f32.mrb[2].mxu1  ;;  %468 = vpow2.f32 %v270_v61  ;;  %v272_v5 = vmul.f32 1.442695, %v434_v3  ;;  %v238_v6 = vpop.f32.mrb[3].mxu0 }
  0xf9   :  { %v254_v7 = vpop.f32.mrb[3].mxu1  ;;  %470 = vpow2.f32 %v278_v62  ;;  %v280_v8 = vmul.f32 1.442695, %v438_v4  ;;  %v268_v9 = vmul.f32 1.442695, %v238_v6 }
  0xfa   :  { %472 = vpow2.f32 %v266_v1  ;;  %v276_v10 = vmul.f32 1.442695, %v254_v7 }
  0xfb   :  { %474 = vpow2.f32 %v274_v2 }
  0xfc   :  { %476 = vpow2.f32 %v272_v5 }
  0xfd   :  { %478 = vpow2.f32 %v280_v8 }
  0xfe   :  { %480 = vpow2.f32 %v268_v9 }
  0xff   :  { %482 = vpow2.f32 %v276_v10 }
 0x102   :  { %v469_v11 = vpop.eup %468 }
 0x103   :  { %v471_v12 = vpop.eup %470  ;;  %v298_v13 = vsel %vm23_vm0, %v469_v11, 0.0 }
 0x104   :  { %v473_v14 = vpop.eup %472  ;;  %v299_v15 = vrot.slane %v298_v13, 4  ;;  %v326_v16 = vsel %vm23_vm0, %v471_v12, 0.0 }
 0x105   :  { %v475_v17 = vpop.eup %474  ;;  %v327_v18 = vrot.slane %v326_v16, 4  ;;  %v284_v19 = vsel %vm23_vm0, %v473_v14, 0.0 }
 0x106   :  { %v477_v20 = vpop.eup %476  ;;  %v300_v21 = vadd.f32 %v299_v15, %v298_v13  ;;  %v285_v22 = vrot.slane %v284_v19, 4  ;;  %v312_v23 = vsel %vm23_vm0, %v475_v17, 0.0  ;;  %v282_v15 = vld [vmem:[#allocation2] sm:$0xff] }
 0x107   :  { %v479_v24 = vpop.eup %478  ;;  %v313_v25 = vrot.slane %v312_v23, 4  ;;  %v305_v26 = vsel %vm23_vm0, %v477_v20, 0.0  ;;  %v328_v28 = vadd.f32 %v327_v18, %v326_v16 }
 0x108   :  { %v481_v27 = vpop.eup %480  ;;  %v286_v29 = vadd.f32 %v285_v22, %v284_v19  ;;  %v306_v30 = vrot.slane %v305_v26, 4  ;;  %v333_v31 = vsel %vm23_vm0, %v479_v24, 0.0  ;;  %v301_v33 = vrot.slane %v300_v21, 2  ;;  %v370_v22 = vld [vmem:[%s592_s0] sm:$0xff] }
 0x109   :  { %v483_v32 = vpop.eup %482  ;;  %v314_v34 = vadd.f32 %v313_v25, %v312_v23  ;;  %v334_v35 = vrot.slane %v333_v31, 4  ;;  %v291_v36 = vsel %vm23_vm0, %v481_v27, 0.0  ;;  %v329_v47 = vrot.slane %v328_v28, 2 }
 0x10a   :  { %v287_v37 = vrot.slane %v286_v29, 2  ;;  %v307_v38 = vadd.f32 %v306_v30, %v305_v26  ;;  %v292_v39 = vrot.slane %v291_v36, 4  ;;  %v319_v42 = vsel %vm23_vm0, %v483_v32, 0.0 }
 0x10b   :  { %v315_v40 = vrot.slane %v314_v34, 2  ;;  %v335_v41 = vadd.f32 %v334_v35, %v333_v31  ;;  %v302_v46 = vadd.f32 %v301_v33, %v300_v21  ;;  %v320_v48 = vrot.slane %v319_v42, 4 }
 0x10c   :  { %v288_v43 = vadd.f32 %v287_v37, %v286_v29  ;;  %v308_v44 = vrot.slane %v307_v38, 2  ;;  %v293_v45 = vadd.f32 %v292_v39, %v291_v36  ;;  %v330_v57 = vadd.f32 %v329_v47, %v328_v28 }
 0x10d   :  { %v336_v50 = vrot.slane %v335_v41, 2  ;;  %v316_v52 = vadd.f32 %v315_v40, %v314_v34  ;;  %v321_v53 = vadd.f32 %v320_v48, %v319_v42  ;;  %v303_v56 = vrot.slane %v302_v46, 1 }
 0x10e   :  { %v309_v49 = vadd.f32 %v308_v44, %v307_v38  ;;  %v294_v51 = vrot.slane %v293_v45, 2  ;;  %v289_v54 = vrot.slane %v288_v43, 1  ;;  %v331_v3 = vrot.slane %v330_v57, 1 }
 0x10f   :  { %v322_v58 = vrot.slane %v321_v53, 2  ;;  %v337_v60 = vadd.f32 %v336_v50, %v335_v41  ;;  %v317_v62 = vrot.slane %v316_v52, 1  ;;  %v304_v2 = vadd.f32 %v303_v56, %v302_v46 }
 0x110   :  { %v295_v55 = vadd.f32 %v294_v51, %v293_v45  ;;  %v310_v59 = vrot.slane %v309_v49, 1  ;;  %v290_v0 = vadd.f32 %v289_v54, %v288_v43  ;;  %v332_v12 = vadd.f32 %v331_v3, %v330_v57 }
 0x111   :  { %v323_v63 = vadd.f32 %v322_v58, %v321_v53  ;;  %v338_v6 = vrot.slane %v337_v60, 1  ;;  %v318_v8 = vadd.f32 %v317_v62, %v316_v52 }
 0x112   :  { %v296_v61 = vrot.slane %v295_v55, 1  ;;  %v311_v5 = vadd.f32 %v310_v59, %v309_v49 }
 0x113   :  { %v324_v4 = vrot.slane %v323_v63, 1  ;;  %v339_v14 = vadd.f32 %v338_v6, %v337_v60 }
 0x114   :  { %v297_v1 = vadd.f32 %v296_v61, %v295_v55 }
 0x115   :  { %v325_v10 = vadd.f32 %v324_v4, %v323_v63 }
 0x116   :  { %v349_v7 = vsel %vm348_vm1, %v297_v1, %v290_v0 }
 0x117   :  { %v351_v9 = vsel %vm350_vm2, %v304_v2, %v349_v7 }
 0x118   :  { %v353_v11 = vsel %vm352_vm3, %v311_v5, %v351_v9 }
 0x119   :  { %v355_v13 = vsel %vm354_vm4, %v318_v8, %v353_v11 }
 0x11a   :  { %v357_v16 = vsel %vm356_vm5, %v325_v10, %v355_v13 }
 0x11b   :  { %v359_v17 = vsel %vm358_vm6, %v332_v12, %v357_v16 }
 0x11c   :  { %v361_v18 = vsel %vm360_vm7, %v339_v14, %v359_v17 }
 0x11d   :  { %v363_v19 = vadd.f32 %v361_v18, %v282_v15 }
 0x11f   :  { %364 = vst.msk [vmem:[#allocation2] sm:$0xff] %vm23_vm0, %v363_v19 }
 0x126   :  { %v368_v20 = vld [vmem:[#allocation2] sm:$0xff] }
 0x127   :  { %v402_v21 = vadd.f32 -1.0, %v368_v20 }
 0x129   :  { %372 = vrot.lane.b32.xlu0 %v402_v21, %s510_s3 }
 0x19b   :  { %v373_v23 = vpop.permute.xlu0 %372 }
 0x19c   :  { %v376_v24 = vsel %vm375_vm8, %v370_v22, %v373_v23 }
 0x19d   :  { %v378_v25 = vsel %vm377_vm9, %v376_v24, 0.0 }
 0x19e   :  { %379 = vst [vmem:[#allocation3] sm:$0xff] %v378_v25 }
 0x19f   :  { %495 = shalt.err (!%p492_p4)
}
 0x1a0   :  { %s496_s0 = scalar_lea.hbm %s596_s4, 128 }
 0x1a1   :  { %p497_p5 = scmp.ne.s32.totalorder %s596_s4, %s496_s0  ;;  %p500_p6 = scmp.lt.u32.totalorder %s496_s0, %s596_s4 }
 0x1a3   :  { %p502_p7 = pnand %p500_p6, %p497_p5 }
 0x1a5   :  { %505 = shalt.err (!%p502_p7)
}
 0x1a6   :  { %389 = dma.vmem_to_hbm [thread:$0]  %s387_s10, 128, %s596_s4, [#allocation4]  }
 0x1a7   :  { %506 = dma.done.wait [#allocation4], 128  }
 0x1a8   :  { %507 = vsyncadd [#allocation4], 4294967168 }
 0x1a9   :  { %393 = vsyncpa [#allocation4], 1 }

</bundles_post_ra>
